<compile_context>
chip_gen: v7x
topology: tpu7x:2x2x1
jax: 0.10.0
libtpu: 0.0.40
codegen_flags: <defaults>
</compile_context>

<pallas_src>
import functools

import jax
import jax.numpy as jnp
from jax.experimental import pallas as pl
from jax.experimental.pallas import tpu as pltpu


def _round_up(x, m):
    return ((x + m - 1) // m) * m


def _cdiv(a, b):
    return (a + b - 1) // b


def _layernorm_kernel(x_ref, a_ref, b_ref, o_ref, *, eps, hidden, h_pad):
    # x_ref: (tm, h_pad) tile of rows; a_ref/b_ref: (1, h_pad) params broadcast
    # over rows.  Padded lanes (>= hidden) hold zeros in x/a/b.
    x = x_ref[...].astype(jnp.float32)
    # Sum over the (zero-padded) lanes, divide by the REAL hidden size.
    mean = jnp.sum(x, axis=-1, keepdims=True) / jnp.float32(hidden)
    diff = x - mean          # after this, x is dead: one live full-tile f32 temp
    if h_pad != hidden:
        # Mask padded lanes so they do not contribute to the variance; also makes
        # the (discarded) padded output lanes finite.
        lane = jax.lax.broadcasted_iota(jnp.int32, (1, h_pad), 1)
        diff = jnp.where(lane < hidden, diff, jnp.float32(0.0))
    # torch.std is unbiased (Bessel's correction, N-1 denominator) by default.
    var = jnp.sum(diff * diff, axis=-1, keepdims=True) / jnp.float32(hidden - 1)
    # One exact reciprocal per row (shape (tm, 1)); eps added to std (not var).
    inv = pl.reciprocal(jnp.sqrt(var) + jnp.float32(eps), approx=False)
    a = a_ref[...].astype(jnp.float32)
    b = b_ref[...].astype(jnp.float32)
    o_ref[...] = (diff * inv * a + b).astype(o_ref.dtype)


def _tpu_budgets():
    """(tile_budget_bytes, vmem_limit_bytes, is_small_vmem_part)."""
    vmem_cap = None
    try:
        vmem_cap = int(pltpu.get_tpu_info().vmem_capacity_bytes)
    except Exception:
        vmem_cap = None
    if vmem_cap is None:
        vmem_cap = 64 * 1024 * 1024          # conservative default (v7x-sized)
    small = vmem_cap <= 80 * 1024 * 1024     # v7x: 64 MiB / TC
    if small:
        return 16 * 1024 * 1024, 40 * 1024 * 1024, True
    # v5e / v6e: 128 MiB VMEM — use the headroom.
    return 40 * 1024 * 1024, 96 * 1024 * 1024, False


def _choose_row_tile(rows, h_pad, itemsize, tile_budget_bytes):
    """Row tile: >= ~16 MiB of in+out HBM traffic per step, capped by VMEM budget."""
    # HBM traffic per row per grid step (input tile + output tile).
    hbm_bytes_per_row = 2 * h_pad * itemsize
    # VMEM per row: double-buffered input + output tiles, plus ~2 full-width f32
    # temporaries live inside the body (upcast/diff + one fused intermediate).
    vmem_bytes_per_row = 4 * h_pad * itemsize + 8 * h_pad
    budget_tm = tile_budget_bytes // max(vmem_bytes_per_row, 1)

    target_step_bytes = 16 * 1024 * 1024
    target_tm = _cdiv(target_step_bytes, max(hbm_bytes_per_row, 1))

    tm = min(budget_tm, max(target_tm, 8))
    tm = max(8, (int(tm) // 8) * 8)          # sublane (8) alignment
    tm = min(tm, _round_up(rows, 8))         # never bigger than the row count needs
    return max(tm, 8)


def layer_norm(x, a_2, b_2, *, eps=1e-6, row_tile=None):
    """LayerNorm over the last axis of x, matching the custom PyTorch module."""
    orig_shape = x.shape
    hidden = int(orig_shape[-1])
    rows = 1
    for d in orig_shape[:-1]:
        rows *= int(d)

    x2 = x.reshape(rows, hidden)
    a2 = a_2.reshape(1, hidden)
    b2 = b_2.reshape(1, hidden)

    # Lane-density guard: pad hidden to a multiple of 128 so stores are unmasked.
    h_pad = _round_up(hidden, 128)
    if h_pad != hidden:
        pad = ((0, 0), (0, h_pad - hidden))
        x2 = jnp.pad(x2, pad)
        a2 = jnp.pad(a2, pad)
        b2 = jnp.pad(b2, pad)

    tile_budget, vmem_limit, small_vmem = _tpu_budgets()
    tm = row_tile if row_tile is not None else _choose_row_tile(
        rows, h_pad, jnp.dtype(x.dtype).itemsize, tile_budget)

    grid = (_cdiv(rows, tm),)  # ragged last block handled by Pallas masked stores

    kernel = functools.partial(_layernorm_kernel, eps=eps, hidden=hidden, h_pad=h_pad)

    def _run(dim_sem):
        return pl.pallas_call(
            kernel,
            out_shape=jax.ShapeDtypeStruct((rows, h_pad), x.dtype),
            grid_spec=pltpu.PrefetchScalarGridSpec(
                num_scalar_prefetch=0,
                grid=grid,
                in_specs=[
                    pl.BlockSpec((tm, h_pad), lambda i: (i, 0)),
                    pl.BlockSpec((1, h_pad), lambda i: (0, 0)),
                    pl.BlockSpec((1, h_pad), lambda i: (0, 0)),
                ],
                out_specs=pl.BlockSpec((tm, h_pad), lambda i: (i, 0)),
            ),
            compiler_params=pltpu.CompilerParams(
                dimension_semantics=(dim_sem,),
                vmem_limit_bytes=vmem_limit,
            ),
        )(x2, a2, b2)

    if small_vmem:
        # v7x-sized part (2 TensorCores): split the row axis across cores.
        core_parallel = getattr(pltpu, "CORE_PARALLEL", "parallel")
        try:
            out = _run(core_parallel)
        except Exception:
            out = _run("parallel")
    else:
        out = _run("parallel")

    if h_pad != hidden:
        out = out[:, :hidden]
    return out.reshape(orig_shape)


def _reference_layer_norm(x, a_2, b_2, eps=1e-6):
    x32 = x.astype(jnp.float32)
    mean = jnp.mean(x32, axis=-1, keepdims=True)
    diff = x32 - mean
    var = jnp.sum(diff * diff, axis=-1, keepdims=True) / (x.shape[-1] - 1)
    std = jnp.sqrt(var)
    return (a_2 * diff / (std + eps) + b_2).astype(x.dtype)


if __name__ == "__main__":
    key = jax.random.PRNGKey(0)
    batch, seq, hidden = 2, 8, 32

    x = jax.random.normal(key, (batch, seq, hidden), dtype=jnp.float32)

    # Deterministic parameter init, exactly as the module's __init__:
    #   a_2 = ones(size), b_2 = zeros(size)
    a_2 = jnp.ones((hidden,), dtype=jnp.float32)
    b_2 = jnp.zeros((hidden,), dtype=jnp.float32)

    out = layer_norm(x, a_2, b_2, eps=1e-6)
    out = jax.block_until_ready(out)

    ref = _reference_layer_norm(x, a_2, b_2, eps=1e-6)
    assert out.shape == x.shape
    assert jnp.allclose(out, ref, atol=1e-5, rtol=1e-5)

    print("KERNEL_OK")
</pallas_src>

<mosaic_0001>
module attributes {stable_mosaic.version = 11 : i64} {
  func.func @_layernorm_kernel(%arg0: i32, %arg1: memref<16x128xf32, #tpu.memory_space<vmem>>, %arg2: memref<1x128xf32, #tpu.memory_space<vmem>>, %arg3: memref<1x128xf32, #tpu.memory_space<vmem>>, %arg4: memref<16x128xf32, #tpu.memory_space<vmem>>) attributes {dimension_semantics = [#tpu.dimension_semantics<core_parallel>], iteration_bounds = array<i64: 1>, scalar_prefetch = 0 : i64, scratch_operands = 0 : i64, tpu.core_type = #tpu.core_type<tc>, window_params = [{transform_indices = @transform_0, window_bounds = array<i64: 16, 128>}, {pipeline_mode = #tpu.pipeline_mode<synchronous>, transform_indices = @transform_1, window_bounds = array<i64: 1, 128>}, {pipeline_mode = #tpu.pipeline_mode<synchronous>, transform_indices = @transform_2, window_bounds = array<i64: 1, 128>}, {transform_indices = @transform_3, window_bounds = array<i64: 16, 128>}]} {
    %c0 = arith.constant 0 : index
    %c0_0 = arith.constant 0 : index
    %0 = vector.load %arg1[%c0, %c0_0] : memref<16x128xf32, #tpu.memory_space<vmem>>, vector<16x128xf32>
    %cst = arith.constant dense<0.000000e+00> : vector<16xf32>
    %1 = vector.multi_reduction <add>, %0, %cst [1] : vector<16x128xf32> to vector<16xf32>
    %2 = vector.shape_cast %1 : vector<16xf32> to vector<16x1xf32>
    %cst_1 = arith.constant 3.200000e+01 : f32
    %3 = vector.broadcast %cst_1 : f32 to vector<16x1xf32>
    %4 = arith.divf %2, %3 : vector<16x1xf32>
    %5 = vector.broadcast %4 : vector<16x1xf32> to vector<16x128xf32>
    %6 = arith.subf %0, %5 : vector<16x128xf32>
    %7 = tpu.iota {dimensions = array<i32: 1>} : vector<1x128xi32>
    %c32_i32 = arith.constant 32 : i32
    %8 = vector.broadcast %c32_i32 : i32 to vector<1x128xi32>
    %9 = arith.cmpi slt, %7, %8 : vector<1x128xi32>
    %cst_2 = arith.constant 0.000000e+00 : f32
    %10 = vector.shape_cast %9 : vector<1x128xi1> to vector<1x128xi1>
    %11 = vector.broadcast %10 : vector<1x128xi1> to vector<16x128xi1>
    %12 = vector.broadcast %cst_2 : f32 to vector<16x128xf32>
    %13 = arith.select %11, %6, %12 : vector<16x128xi1>, vector<16x128xf32>
    %14 = arith.mulf %13, %13 : vector<16x128xf32>
    %cst_3 = arith.constant dense<0.000000e+00> : vector<16xf32>
    %15 = vector.multi_reduction <add>, %14, %cst_3 [1] : vector<16x128xf32> to vector<16xf32>
    %16 = vector.shape_cast %15 : vector<16xf32> to vector<16x1xf32>
    %cst_4 = arith.constant 3.100000e+01 : f32
    %17 = vector.broadcast %cst_4 : f32 to vector<16x1xf32>
    %18 = arith.divf %16, %17 : vector<16x1xf32>
    %19 = math.sqrt %18 : vector<16x1xf32>
    %cst_5 = arith.constant 9.99999997E-7 : f32
    %20 = vector.broadcast %cst_5 : f32 to vector<16x1xf32>
    %21 = arith.addf %19, %20 : vector<16x1xf32>
    %22 = tpu.reciprocal %21 : vector<16x1xf32> -> vector<16x1xf32>
    %c0_6 = arith.constant 0 : index
    %c0_7 = arith.constant 0 : index
    %23 = vector.load %arg2[%c0_6, %c0_7] : memref<1x128xf32, #tpu.memory_space<vmem>>, vector<1x128xf32>
    %c0_8 = arith.constant 0 : index
    %c0_9 = arith.constant 0 : index
    %24 = vector.load %arg3[%c0_8, %c0_9] : memref<1x128xf32, #tpu.memory_space<vmem>>, vector<1x128xf32>
    %25 = vector.broadcast %22 : vector<16x1xf32> to vector<16x128xf32>
    %26 = arith.mulf %13, %25 : vector<16x128xf32>
    %27 = vector.broadcast %23 : vector<1x128xf32> to vector<16x128xf32>
    %28 = arith.mulf %26, %27 : vector<16x128xf32>
    %29 = vector.broadcast %24 : vector<1x128xf32> to vector<16x128xf32>
    %30 = arith.addf %28, %29 : vector<16x128xf32>
    %c0_10 = arith.constant 0 : index
    %c0_11 = arith.constant 0 : index
    %31 = vector.load %arg4[%c0_10, %c0_11] : memref<16x128xf32, #tpu.memory_space<vmem>>, vector<16x128xf32>
    tpu.vector_store %arg4[%c0_10, %c0_11], %30 {strides = array<i32>} : memref<16x128xf32, #tpu.memory_space<vmem>>, vector<16x128xf32>,
    return
  }
  func.func @transform_0(%arg0: i32) -> (i32, i32) {
    %c0_i32 = arith.constant 0 : i32
    %c0_i32_0 = arith.constant 0 : i32
    return %arg0, %c0_i32 : i32, i32
  }
  func.func @transform_1(%arg0: i32) -> (i32, i32) {
    %c0_i32 = arith.constant 0 : i32
    %c0_i32_0 = arith.constant 0 : i32
    %c0_i32_1 = arith.constant 0 : i32
    return %c0_i32, %c0_i32_0 : i32, i32
  }
  func.func @transform_2(%arg0: i32) -> (i32, i32) {
    %c0_i32 = arith.constant 0 : i32
    %c0_i32_0 = arith.constant 0 : i32
    %c0_i32_1 = arith.constant 0 : i32
    return %c0_i32, %c0_i32_0 : i32, i32
  }
  func.func @transform_3(%arg0: i32) -> (i32, i32) {
    %c0_i32 = arith.constant 0 : i32
    %c0_i32_0 = arith.constant 0 : i32
    return %arg0, %c0_i32 : i32, i32
  }
}

module attributes {stable_mosaic.version = 11 : i64} {
  func.func @_layernorm_kernel(%arg0: i32, %arg1: memref<16x128xf32, #tpu.memory_space<vmem>>, %arg2: memref<1x128xf32, #tpu.memory_space<vmem>>, %arg3: memref<1x128xf32, #tpu.memory_space<vmem>>, %arg4: memref<16x128xf32, #tpu.memory_space<vmem>>) attributes {dimension_semantics = [#tpu.dimension_semantics<parallel>], iteration_bounds = array<i64: 1>, scalar_prefetch = 0 : i64, scratch_operands = 0 : i64, tpu.core_type = #tpu.core_type<tc>, window_params = [{transform_indices = @transform_0, window_bounds = array<i64: 16, 128>}, {pipeline_mode = #tpu.pipeline_mode<synchronous>, transform_indices = @transform_1, window_bounds = array<i64: 1, 128>}, {pipeline_mode = #tpu.pipeline_mode<synchronous>, transform_indices = @transform_2, window_bounds = array<i64: 1, 128>}, {transform_indices = @transform_3, window_bounds = array<i64: 16, 128>}]} {
    %c0 = arith.constant 0 : index
    %c0_0 = arith.constant 0 : index
    %0 = vector.load %arg1[%c0, %c0_0] : memref<16x128xf32, #tpu.memory_space<vmem>>, vector<16x128xf32>
    %cst = arith.constant dense<0.000000e+00> : vector<16xf32>
    %1 = vector.multi_reduction <add>, %0, %cst [1] : vector<16x128xf32> to vector<16xf32>
    %2 = vector.shape_cast %1 : vector<16xf32> to vector<16x1xf32>
    %cst_1 = arith.constant 3.200000e+01 : f32
    %3 = vector.broadcast %cst_1 : f32 to vector<16x1xf32>
    %4 = arith.divf %2, %3 : vector<16x1xf32>
    %5 = vector.broadcast %4 : vector<16x1xf32> to vector<16x128xf32>
    %6 = arith.subf %0, %5 : vector<16x128xf32>
    %7 = tpu.iota {dimensions = array<i32: 1>} : vector<1x128xi32>
    %c32_i32 = arith.constant 32 : i32
    %8 = vector.broadcast %c32_i32 : i32 to vector<1x128xi32>
    %9 = arith.cmpi slt, %7, %8 : vector<1x128xi32>
    %cst_2 = arith.constant 0.000000e+00 : f32
    %10 = vector.shape_cast %9 : vector<1x128xi1> to vector<1x128xi1>
    %11 = vector.broadcast %10 : vector<1x128xi1> to vector<16x128xi1>
    %12 = vector.broadcast %cst_2 : f32 to vector<16x128xf32>
    %13 = arith.select %11, %6, %12 : vector<16x128xi1>, vector<16x128xf32>
    %14 = arith.mulf %13, %13 : vector<16x128xf32>
    %cst_3 = arith.constant dense<0.000000e+00> : vector<16xf32>
    %15 = vector.multi_reduction <add>, %14, %cst_3 [1] : vector<16x128xf32> to vector<16xf32>
    %16 = vector.shape_cast %15 : vector<16xf32> to vector<16x1xf32>
    %cst_4 = arith.constant 3.100000e+01 : f32
    %17 = vector.broadcast %cst_4 : f32 to vector<16x1xf32>
    %18 = arith.divf %16, %17 : vector<16x1xf32>
    %19 = math.sqrt %18 : vector<16x1xf32>
    %cst_5 = arith.constant 9.99999997E-7 : f32
    %20 = vector.broadcast %cst_5 : f32 to vector<16x1xf32>
    %21 = arith.addf %19, %20 : vector<16x1xf32>
    %22 = tpu.reciprocal %21 : vector<16x1xf32> -> vector<16x1xf32>
    %c0_6 = arith.constant 0 : index
    %c0_7 = arith.constant 0 : index
    %23 = vector.load %arg2[%c0_6, %c0_7] : memref<1x128xf32, #tpu.memory_space<vmem>>, vector<1x128xf32>
    %c0_8 = arith.constant 0 : index
    %c0_9 = arith.constant 0 : index
    %24 = vector.load %arg3[%c0_8, %c0_9] : memref<1x128xf32, #tpu.memory_space<vmem>>, vector<1x128xf32>
    %25 = vector.broadcast %22 : vector<16x1xf32> to vector<16x128xf32>
    %26 = arith.mulf %13, %25 : vector<16x128xf32>
    %27 = vector.broadcast %23 : vector<1x128xf32> to vector<16x128xf32>
    %28 = arith.mulf %26, %27 : vector<16x128xf32>
    %29 = vector.broadcast %24 : vector<1x128xf32> to vector<16x128xf32>
    %30 = arith.addf %28, %29 : vector<16x128xf32>
    %c0_10 = arith.constant 0 : index
    %c0_11 = arith.constant 0 : index
    %31 = vector.load %arg4[%c0_10, %c0_11] : memref<16x128xf32, #tpu.memory_space<vmem>>, vector<16x128xf32>
    tpu.vector_store %arg4[%c0_10, %c0_11], %30 {strides = array<i32>} : memref<16x128xf32, #tpu.memory_space<vmem>>, vector<16x128xf32>,
    return
  }
  func.func @transform_0(%arg0: i32) -> (i32, i32) {
    %c0_i32 = arith.constant 0 : i32
    %c0_i32_0 = arith.constant 0 : i32
    return %arg0, %c0_i32 : i32, i32
  }
  func.func @transform_1(%arg0: i32) -> (i32, i32) {
    %c0_i32 = arith.constant 0 : i32
    %c0_i32_0 = arith.constant 0 : i32
    %c0_i32_1 = arith.constant 0 : i32
    return %c0_i32, %c0_i32_0 : i32, i32
  }
  func.func @transform_2(%arg0: i32) -> (i32, i32) {
    %c0_i32 = arith.constant 0 : i32
    %c0_i32_0 = arith.constant 0 : i32
    %c0_i32_1 = arith.constant 0 : i32
    return %c0_i32, %c0_i32_0 : i32, i32
  }
  func.func @transform_3(%arg0: i32) -> (i32, i32) {
    %c0_i32 = arith.constant 0 : i32
    %c0_i32_0 = arith.constant 0 : i32
    return %arg0, %c0_i32 : i32, i32
  }
}

</mosaic_0001>

<bundles_post_ra>
// kernel: tpu_custom_call.1
= control target key start
LH: loop header
LB: loop body
LE: loop exit
PB: predicated region body
PF: predicated region fallthrough
CT: control target
= control target key end

     0   :  { %s221_s12 = sld [smem:[#allocation0]]   ;;  %s258_s0 = inlined_call_operand.hbm [shape: f32[16,128], index: 0, kind: input, shape index: {}]   ;;  %s259_s1 = inlined_call_operand.vmem [shape: f32[1,128], index: 1, kind: input, shape index: {}]   ;;  %s260_s2 = inlined_call_operand.vmem [shape: f32[1,128], index: 2, kind: input, shape index: {}]   ;;  %s261_s3 = inlined_call_operand.hbm [shape: f32[16,128], index: 3, kind: output, shape index: {}]  }
   0x1   :  { %8 = vsyncpa [#allocation3], 0 }
   0x2   :  { %9 = vsyncpa [#allocation4], 0  ;;  %s197_s17 = smov [#allocation2]   ;;  %s147_s22 = scalar_lea.hbm %s258_s0, 256 }
   0x3   :  { %s18_s18 = sshll.u32 %s197_s17, 4  ;;  %s19_s18 = int_to_ptr.vmem [resolvable:$true] %s18_s18 }
   0x6   :  { %s131_s13 = sshll.u32 %s221_s12, 8 }
   0x7   :  { %s17_s16 = scalar_lea.hbm %s258_s0, %s131_s13 }
   0x8   :  { %s145_s19 = scalar_lea.hbm %s17_s16, 256  ;;  %p148_p1 = scmp.lt.u32.totalorder %s17_s16, %s258_s0 }
   0x9   :  { %p146_p0 = scmp.ne.s32.totalorder %s17_s16, %s145_s19  ;;  %p149_p2 = scmp.lt.u32.totalorder %s147_s22, %s145_s19 }
   0xa   :  { %p151_p4 = scmp.lt.u32.totalorder %s145_s19, %s17_s16 }
   0xb   :  { %p150_p3 = por %p149_p2, %p148_p1 }
   0xd   :  { %p152_p5 = por %p151_p4, %p150_p3 }
   0xf   :  { %p153_p6 = pnand %p152_p5, %p146_p0 }
  0x11   :  { %156 = shalt.err (!%p153_p6)
}
  0x12   :  { %s157_s25 = scalar_lea.vmem %s19_s18, 256  ;;  %p162_p8 = scmp.lt.s32.totalorder %s19_s18, %s19_s18 }
  0x13   :  { %p158_p7 = scmp.ne.s32.totalorder %s19_s18, %s157_s25  ;;  %p163_p9 = scmp.lt.s32.totalorder %s157_s25, %s157_s25 }
  0x15   :  { %p164_p10 = por %p163_p9, %p162_p8 }
  0x17   :  { %p165_p11 = pnand %p164_p10, %p158_p7 }
  0x19   :  { %168 = shalt.err (!%p165_p11)
}
  0x1a   :  { %s198_s26 = smov 128   ;;  %s199_s27 = smov 8  }
  0x1b   :  { %24 = dma.hbm_to_vmem [thread:$0]  %s17_s16, 256, %s19_s18, [#allocation3], %s198_s26, %s198_s26, %s199_s27  }
  0x1c   :  { %193 = dma.done.wait [#allocation3], 256  }
  0x1d   :  { %194 = vsyncadd [#allocation3], 4294967040  ;;  %v34_v0 = vld [vmem:[#allocation2] sm:$0xff]  ;;  %v35_v1 = vld [vmem:[#allocation2 + $0x8] sm:$0xff]  ;;  %v45_v2 = vlaneseq  ;;  %s200_s4 = smov [#allocation5]   ;;  %s108_s8 = scalar_lea.hbm %s261_s3, %s131_s13 }
  0x1e   :  { %36 = vadd.xlane.f32.xlu0 %v34_v0  ;;  %v127_v31 = vld [vmem:[%s259_s1] ss:$0 sm:$0xff]  ;;  %s109_s5 = sshll.u32 %s200_s4, 4  ;;  %s110_s5 = int_to_ptr.vmem [resolvable:$true] %s109_s5 }
  0x1f   :  { %v46_v3 = vand.u32 127, %v45_v2  ;;  %v128_v33 = vld [vmem:[%s260_s2] ss:$0 sm:$0xff]  ;;  %s169_s1 = scalar_lea.vmem %s110_s5, 256  ;;  %p174_p13 = scmp.lt.s32.totalorder %s110_s5, %s110_s5 }
  0x20   :  { %p170_p12 = scmp.ne.s32.totalorder %s110_s5, %s169_s1  ;;  %p175_p0 = scmp.lt.s32.totalorder %s169_s1, %s169_s1 }
  0x21   :  { %vm47_vm0 = vcmp.lt.s32.totalorder %v46_v3, 32 }
  0x22   :  { %38 = vadd.xlane.f32.xlu0 %v35_v1  ;;  %p176_p1 = por %p175_p0, %p174_p13 }
  0x24   :  { %p177_p2 = pnand %p176_p1, %p170_p12 }
  0xab   :  { %v37_v4 = vpop.xlane.xlu0 %36 }
  0xac   :  { %v41_v5 = vmul.f32 0.03125, %v37_v4 }
  0xae   :  { %v43_v6 = vsub.f32 %v34_v0, %v41_v5 }
  0xaf   :  { %v39_v7 = vpop.xlane.xlu0 %38 }
  0xb0   :  { %v42_v8 = vmul.f32 0.03125, %v39_v7  ;;  %v50_v9 = vsel %vm47_vm0, %v43_v6, 0.0 }
  0xb1   :  { %v52_v10 = vmul.f32 %v50_v9, %v50_v9 }
  0xb2   :  { %v44_v11 = vsub.f32 %v35_v1, %v42_v8 }
  0xb3   :  { %54 = vadd.xlane.f32.xlu1 %v52_v10 }
  0xb4   :  { %v51_v12 = vsel %vm47_vm0, %v44_v11, 0.0 }
  0xb5   :  { %v53_v13 = vmul.f32 %v51_v12, %v51_v12 }
  0xb7   :  { %56 = vadd.xlane.f32.xlu1 %v53_v13 }
 0x140   :  { %v55_v14 = vpop.xlane.xlu1 %54 }
 0x141   :  { %v59_v15 = vmul.f32 0.032258064, %v55_v14 }
 0x143   :  { %137 = vrsqrt.f32 %v59_v15  ;;  %vm63_vm1 = vcmp.eq.f32.partialorder %v59_v15, inf  ;;  %v66_v20 = vand.u32 2147483648, %v59_v15  ;;  %vm65_vm2 = vcmp.eq.f32.partialorder %v59_v15, 0.0 }
 0x144   :  { %v57_v16 = vpop.xlane.xlu1 %56 }
 0x145   :  { %v60_v17 = vmul.f32 0.032258064, %v57_v16 }
 0x147   :  { %139 = vrsqrt.f32 %v60_v17  ;;  %vm70_vm3 = vcmp.eq.f32.partialorder %v60_v17, inf  ;;  %v73_v26 = vand.u32 2147483648, %v60_v17  ;;  %vm72_vm4 = vcmp.eq.f32.partialorder %v60_v17, 0.0 }
 0x14d   :  { %v138_v18 = vpop.eup %137 }
 0x14e   :  { %v62_v19 = vmul.f32 %v138_v18, %v59_v15 }
 0x150   :  { %v64_v21 = vsel %vm63_vm1, %v59_v15, %v62_v19 }
 0x151   :  { %v140_v22 = vpop.eup %139  ;;  %v67_v23 = vsel %vm65_vm2, %v66_v20, %v64_v21 }
 0x152   :  { %v75_v24 = vadd.f32 1e-06, %v67_v23  ;;  %v69_v25 = vmul.f32 %v140_v22, %v60_v17 }
 0x154   :  { %141 = vrcp.f32 %v75_v24  ;;  %v71_v27 = vsel %vm70_vm3, %v60_v17, %v69_v25 }
 0x155   :  { %v74_v28 = vsel %vm72_vm4, %v73_v26, %v71_v27 }
 0x156   :  { %v76_v29 = vadd.f32 1e-06, %v74_v28 }
 0x158   :  { %143 = vrcp.f32 %v76_v29 }
 0x15e   :  { %v142_v30 = vpop.eup %141 }
 0x15f   :  { %v81_v32 = vmul.f32 %v142_v30, %v50_v9 }
 0x161   :  { %v89_v34 = vmul.f32 %v127_v31, %v81_v32 }
 0x162   :  { %v144_v35 = vpop.eup %143 }
 0x163   :  { %v82_v36 = vmul.f32 %v144_v35, %v51_v12  ;;  %v97_v37 = vadd.f32 %v128_v33, %v89_v34 }
 0x165   :  { %v90_v38 = vmul.f32 %v127_v31, %v82_v36  ;;  %99 = vst [vmem:[#allocation5] sm:$0xff] %v97_v37 }
 0x167   :  { %v98_v39 = vadd.f32 %v128_v33, %v90_v38 }
 0x169   :  { %100 = vst [vmem:[#allocation5 + $0x8] sm:$0xff] %v98_v39 }
 0x16a   :  { %180 = shalt.err (!%p177_p2)
}
 0x16b   :  { %s181_s2 = scalar_lea.hbm %s108_s8, 256  ;;  %s183_s11 = scalar_lea.hbm %s261_s3, 256 }
 0x16c   :  { %p182_p3 = scmp.ne.s32.totalorder %s108_s8, %s181_s2  ;;  %p184_p4 = scmp.lt.u32.totalorder %s108_s8, %s261_s3 }
 0x16d   :  { %p185_p5 = scmp.lt.u32.totalorder %s183_s11, %s181_s2  ;;  %p187_p7 = scmp.lt.u32.totalorder %s181_s2, %s108_s8 }
 0x16f   :  { %p186_p6 = por %p185_p5, %p184_p4 }
 0x171   :  { %p188_p8 = por %p187_p7, %p186_p6 }
 0x173   :  { %p189_p9 = pnand %p188_p8, %p182_p3 }
 0x175   :  { %192 = shalt.err (!%p189_p9)
}
 0x176   :  { %115 = dma.vmem_to_hbm [thread:$0]  %s110_s5, 256, %s108_s8, [#allocation4], %s198_s26, %s198_s26, %s199_s27  }
 0x177   :  { %195 = dma.done.wait [#allocation4], 256  }
 0x178   :  { %196 = vsyncadd [#allocation4], 4294967040 }
 0x179   :  { %119 = vsyncpa [#allocation3], 1 }
 0x17a   :  { %120 = vsyncpa [#allocation4], 1 }

// kernel: tpu_custom_call.1
= control target key start
LH: loop header
LB: loop body
LE: loop exit
PB: predicated region body
PF: predicated region fallthrough
CT: control target
= control target key end

     0   :  { %8 = vsyncpa [#allocation3], 0  ;;  %s235_s0 = inlined_call_operand.hbm [shape: f32[16,128], index: 0, kind: input, shape index: {}]   ;;  %s236_s1 = inlined_call_operand.vmem [shape: f32[1,128], index: 1, kind: input, shape index: {}]   ;;  %s237_s2 = inlined_call_operand.vmem [shape: f32[1,128], index: 2, kind: input, shape index: {}]   ;;  %s238_s3 = inlined_call_operand.hbm [shape: f32[16,128], index: 3, kind: output, shape index: {}]  }
   0x1   :  { %9 = vsyncpa [#allocation4], 0  ;;  %s175_s12 = smov [#allocation2]   ;;  %s127_s16 = scalar_lea.hbm %s235_s0, 256 }
   0x2   :  { %s15_s13 = sshll.u32 %s175_s12, 4  ;;  %p128_p0 = scmp.ne.s32.totalorder %s235_s0, %s127_s16  ;;  %s16_s13 = int_to_ptr.vmem [resolvable:$true] %s15_s13 }
   0x3   :  { %p131_p1 = scmp.lt.u32.totalorder %s127_s16, %s235_s0 }
   0x5   :  { %p133_p2 = pnand %p131_p1, %p128_p0 }
   0x7   :  { %136 = shalt.err (!%p133_p2)
}
   0x8   :  { %s137_s21 = scalar_lea.vmem %s16_s13, 256  ;;  %p142_p4 = scmp.lt.s32.totalorder %s16_s13, %s16_s13 }
   0x9   :  { %p138_p3 = scmp.ne.s32.totalorder %s16_s13, %s137_s21  ;;  %p143_p5 = scmp.lt.s32.totalorder %s137_s21, %s137_s21 }
   0xb   :  { %p144_p6 = por %p143_p5, %p142_p4 }
   0xd   :  { %p145_p7 = pnand %p144_p6, %p138_p3 }
   0xf   :  { %148 = shalt.err (!%p145_p7)
}
  0x10   :  { %s176_s22 = smov 128   ;;  %s177_s23 = smov 8  }
  0x11   :  { %21 = dma.hbm_to_vmem [thread:$0]  %s235_s0, 256, %s16_s13, [#allocation3], %s176_s22, %s176_s22, %s177_s23  }
  0x12   :  { %171 = dma.done.wait [#allocation3], 256  }
  0x13   :  { %172 = vsyncadd [#allocation3], 4294967040  ;;  %v29_v0 = vld [vmem:[#allocation2] sm:$0xff]  ;;  %v30_v1 = vld [vmem:[#allocation2 + $0x8] sm:$0xff]  ;;  %v40_v2 = vlaneseq  ;;  %s178_s29 = smov [#allocation5]  }
  0x14   :  { %31 = vadd.xlane.f32.xlu0 %v29_v0  ;;  %v113_v31 = vld [vmem:[%s236_s1] ss:$0 sm:$0xff]  ;;  %s101_s30 = sshll.u32 %s178_s29, 4  ;;  %s102_s30 = int_to_ptr.vmem [resolvable:$true] %s101_s30 }
  0x15   :  { %v41_v3 = vand.u32 127, %v40_v2  ;;  %v114_v33 = vld [vmem:[%s237_s2] ss:$0 sm:$0xff]  ;;  %s149_s4 = scalar_lea.vmem %s102_s30, 256  ;;  %p154_p9 = scmp.lt.s32.totalorder %s102_s30, %s102_s30 }
  0x16   :  { %p150_p8 = scmp.ne.s32.totalorder %s102_s30, %s149_s4  ;;  %p155_p10 = scmp.lt.s32.totalorder %s149_s4, %s149_s4 }
  0x17   :  { %vm42_vm0 = vcmp.lt.s32.totalorder %v41_v3, 32 }
  0x18   :  { %33 = vadd.xlane.f32.xlu0 %v30_v1  ;;  %p156_p11 = por %p155_p10, %p154_p9 }
  0x1a   :  { %p157_p12 = pnand %p156_p11, %p150_p8 }
  0xa1   :  { %v32_v4 = vpop.xlane.xlu0 %31 }
  0xa2   :  { %v36_v5 = vmul.f32 0.03125, %v32_v4 }
  0xa4   :  { %v38_v6 = vsub.f32 %v29_v0, %v36_v5 }
  0xa5   :  { %v34_v7 = vpop.xlane.xlu0 %33 }
  0xa6   :  { %v37_v8 = vmul.f32 0.03125, %v34_v7  ;;  %v45_v9 = vsel %vm42_vm0, %v38_v6, 0.0 }
  0xa7   :  { %v47_v10 = vmul.f32 %v45_v9, %v45_v9 }
  0xa8   :  { %v39_v11 = vsub.f32 %v30_v1, %v37_v8 }
  0xa9   :  { %49 = vadd.xlane.f32.xlu1 %v47_v10 }
  0xaa   :  { %v46_v12 = vsel %vm42_vm0, %v39_v11, 0.0 }
  0xab   :  { %v48_v13 = vmul.f32 %v46_v12, %v46_v12 }
  0xad   :  { %51 = vadd.xlane.f32.xlu1 %v48_v13 }
 0x136   :  { %v50_v14 = vpop.xlane.xlu1 %49 }
 0x137   :  { %v54_v15 = vmul.f32 0.032258064, %v50_v14 }
 0x139   :  { %119 = vrsqrt.f32 %v54_v15  ;;  %vm58_vm1 = vcmp.eq.f32.partialorder %v54_v15, inf  ;;  %v61_v20 = vand.u32 2147483648, %v54_v15  ;;  %vm60_vm2 = vcmp.eq.f32.partialorder %v54_v15, 0.0 }
 0x13a   :  { %v52_v16 = vpop.xlane.xlu1 %51 }
 0x13b   :  { %v55_v17 = vmul.f32 0.032258064, %v52_v16 }
 0x13d   :  { %121 = vrsqrt.f32 %v55_v17  ;;  %vm65_vm3 = vcmp.eq.f32.partialorder %v55_v17, inf  ;;  %v68_v26 = vand.u32 2147483648, %v55_v17  ;;  %vm67_vm4 = vcmp.eq.f32.partialorder %v55_v17, 0.0 }
 0x143   :  { %v120_v18 = vpop.eup %119 }
 0x144   :  { %v57_v19 = vmul.f32 %v120_v18, %v54_v15 }
 0x146   :  { %v59_v21 = vsel %vm58_vm1, %v54_v15, %v57_v19 }
 0x147   :  { %v122_v22 = vpop.eup %121  ;;  %v62_v23 = vsel %vm60_vm2, %v61_v20, %v59_v21 }
 0x148   :  { %v64_v24 = vmul.f32 %v122_v22, %v55_v17  ;;  %v70_v25 = vadd.f32 1e-06, %v62_v23 }
 0x14a   :  { %v66_v27 = vsel %vm65_vm3, %v55_v17, %v64_v24  ;;  %123 = vrcp.f32 %v70_v25 }
 0x14b   :  { %v69_v28 = vsel %vm67_vm4, %v68_v26, %v66_v27 }
 0x14c   :  { %v71_v29 = vadd.f32 1e-06, %v69_v28 }
 0x14e   :  { %125 = vrcp.f32 %v71_v29 }
 0x154   :  { %v124_v30 = vpop.eup %123 }
 0x155   :  { %v76_v32 = vmul.f32 %v124_v30, %v45_v9 }
 0x157   :  { %v84_v34 = vmul.f32 %v113_v31, %v76_v32 }
 0x158   :  { %v126_v35 = vpop.eup %125 }
 0x159   :  { %v77_v36 = vmul.f32 %v126_v35, %v46_v12  ;;  %v92_v37 = vadd.f32 %v114_v33, %v84_v34 }
 0x15b   :  { %v85_v38 = vmul.f32 %v113_v31, %v77_v36  ;;  %94 = vst [vmem:[#allocation5] sm:$0xff] %v92_v37 }
 0x15d   :  { %v93_v39 = vadd.f32 %v114_v33, %v85_v38 }
 0x15f   :  { %95 = vst [vmem:[#allocation5 + $0x8] sm:$0xff] %v93_v39 }
 0x160   :  { %160 = shalt.err (!%p157_p12)
}
 0x161   :  { %s161_s5 = scalar_lea.hbm %s238_s3, 256 }
 0x162   :  { %p162_p13 = scmp.ne.s32.totalorder %s238_s3, %s161_s5  ;;  %p165_p0 = scmp.lt.u32.totalorder %s161_s5, %s238_s3 }
 0x164   :  { %p167_p1 = pnand %p165_p0, %p162_p13 }
 0x166   :  { %170 = shalt.err (!%p167_p1)
}
 0x167   :  { %107 = dma.vmem_to_hbm [thread:$0]  %s102_s30, 256, %s238_s3, [#allocation4], %s176_s22, %s176_s22, %s177_s23  }
 0x168   :  { %173 = dma.done.wait [#allocation4], 256  }
 0x169   :  { %174 = vsyncadd [#allocation4], 4294967040 }
 0x16a   :  { %111 = vsyncpa [#allocation3], 1 }
 0x16b   :  { %112 = vsyncpa [#allocation4], 1 }

</bundles_post_ra>
